<compile_context>
chip_gen: v5e
topology: v5e:2x2
jax: 0.10.0
libtpu: 0.0.40
codegen_flags: <defaults>
</compile_context>

<pallas_src>
import functools
import math
from typing import NamedTuple, Optional

import jax
import jax.numpy as jnp
from jax import lax
from jax.experimental import pallas as pl
from jax.experimental.pallas import tpu as pltpu


_FULL_K_MAX = 2048                        # full-K residency up to this padded K
_VMEM_TILE_BUDGET = 24 * 1024 * 1024      # v7x-safe live-tile budget


def _round_up(x, m):
    return ((x + m - 1) // m) * m


def _cdiv(a, b):
    return (a + b - 1) // b


# -----------------------------------------------------------------------------
# Kernel bodies
# -----------------------------------------------------------------------------

def _kernel_single_k(x_ref, w_ref, b_ref, o_ref, *, scale):
    """in_dim fits one K tile: no accumulator, no init/finalize phases."""
    acc = jnp.dot(x_ref[...], w_ref[...], preferred_element_type=jnp.float32)
    o_ref[...] = (acc * scale + b_ref[...].astype(jnp.float32)).astype(o_ref.dtype)


def _kernel_multi_k_f32out(x_ref, w_ref, b_ref, o_ref, *, scale):
    """Multiple K tiles, f32 output: accumulate directly in the output block."""
    k = pl.program_id(2)

    @pl.when(k == 0)
    def _():
        o_ref[...] = jnp.zeros_like(o_ref)

    o_ref[...] += jnp.dot(x_ref[...], w_ref[...], preferred_element_type=jnp.float32)

    @pl.when(k == pl.num_programs(2) - 1)
    def _():
        o_ref[...] = o_ref[...] * scale + b_ref[...].astype(jnp.float32)


def _kernel_multi_k_acc(x_ref, w_ref, b_ref, o_ref, acc_ref, *, scale):
    """Multiple K tiles, narrow output dtype: f32 VMEM accumulator."""
    k = pl.program_id(2)

    @pl.when(k == 0)
    def _():
        acc_ref[...] = jnp.zeros_like(acc_ref)

    acc_ref[...] += jnp.dot(x_ref[...], w_ref[...], preferred_element_type=jnp.float32)

    @pl.when(k == pl.num_programs(2) - 1)
    def _():
        o_ref[...] = (acc_ref[...] * scale
                      + b_ref[...].astype(jnp.float32)).astype(o_ref.dtype)


# -----------------------------------------------------------------------------
# One-time parameter preparation (hoisted out of the forward hot path)
# -----------------------------------------------------------------------------

class EqualLinearParams(NamedTuple):
    w_t: jax.Array    # (K, N) pre-transposed, zero-padded weight (compute dtype)
    bias: jax.Array   # (1, N) zero-padded bias, float32
    in_dim: int
    out_dim: int
    scale: float
    K: int
    N: int


def _padded_kn(in_dim, out_dim):
    k_pad = _round_up(in_dim, 128)
    K = k_pad if k_pad <= _FULL_K_MAX else _round_up(in_dim, 512)
    N = _round_up(out_dim, 128)
    return K, N


def prepare_equal_linear(weight_orig, bias, compute_dtype: Optional[jnp.dtype] = None):
    """Transpose + pad the weight ONCE (call at module init, not per forward).

    compute_dtype=jnp.bfloat16 halves weight HBM traffic and feeds the MXU at
    bf16 rate on v6e/v7x; accumulation and the scale+bias epilogue stay f32.
    """
    out_dim, in_dim = weight_orig.shape
    K, N = _padded_kn(in_dim, out_dim)
    w = weight_orig if compute_dtype is None else weight_orig.astype(compute_dtype)
    w_t = jnp.pad(w.T, ((0, K - in_dim), (0, N - out_dim)))              # (K, N)
    b_p = jnp.pad(bias.astype(jnp.float32), (0, N - out_dim)).reshape(1, N)
    scale = math.sqrt(2.0 / in_dim)   # fan_in = in_dim * weight[0][0].numel() = in_dim
    return EqualLinearParams(w_t, b_p, in_dim, out_dim, scale, K, N)


# -----------------------------------------------------------------------------
# Tile planning
# -----------------------------------------------------------------------------

def _plan_tiles(batch, K, N, in_bpe, out_bpe):
    tk = K if K <= _FULL_K_MAX else 512
    n_k = K // tk
    tn = 256 if N % 256 == 0 else 128

    m8 = _round_up(max(batch, 1), 8)
    tm_cap = 1024 if batch >= 512 else 256

    def live_bytes(tm):
        b = 2 * (tm * tk + tk * tn) * in_bpe          # double-buffered x / W tiles
        b += 2 * tm * tn * out_bpe                    # double-buffered output tile
        if n_k > 1 and out_bpe != 4:
            b += tm * tn * 4                          # f32 accumulator scratch
        return b

    while tm_cap > 8 and live_bytes(tm_cap) > _VMEM_TILE_BUDGET:
        tm_cap = max(8, tm_cap // 2)

    # Balanced M blocking: avoid padding the batch up to ~2x for awkward sizes.
    nb_m = _cdiv(m8, tm_cap)
    tm = _round_up(_cdiv(m8, nb_m), 8)
    M = nb_m * tm

    # v7x has two TensorCores; expose >= 2 parallel blocks when it is free to
    # do so (no effect on single-TC v5e/v6e beyond ~0.35us of grid overhead).
    if nb_m == 1 and N // tn == 1:
        if N >= 256:
            tn = 128
        elif m8 >= 16:
            tm = _round_up(_cdiv(m8, 2), 8)
            M = 2 * tm

    vmem_limit = int(min(max(live_bytes(tm) * 3 // 2, 32 * 1024 * 1024),
                         48 * 1024 * 1024))
    return tm, tn, tk, M, vmem_limit


# -----------------------------------------------------------------------------
# Forward
# -----------------------------------------------------------------------------

def equal_linear(x, params: EqualLinearParams):
    """y = x @ (scale * weight_orig).T + bias  (weight pre-prepped)."""
    batch, in_dim = x.shape
    assert in_dim == params.in_dim
    K, N = params.K, params.N
    out_dtype = x.dtype
    in_bpe = jnp.dtype(params.w_t.dtype).itemsize
    out_bpe = jnp.dtype(out_dtype).itemsize

    tm, tn, tk, M, vmem_limit = _plan_tiles(batch, K, N, in_bpe, out_bpe)
    n_k = K // tk

    # Only x is padded per call (weight/bias were padded once at prep time).
    x_p = jnp.pad(x.astype(params.w_t.dtype), ((0, M - batch), (0, K - in_dim)))

    cost = pl.CostEstimate(
        flops=2 * M * N * K,
        transcendentals=0,
        bytes_accessed=M * K * in_bpe + K * N * in_bpe + M * N * out_bpe + N * 4,
    )

    if n_k == 1:
        grid = (M // tm, N // tn)
        kernel = functools.partial(_kernel_single_k, scale=params.scale)
        in_specs = [
            pl.BlockSpec((tm, tk), lambda i, j: (i, 0)),   # x tile
            pl.BlockSpec((tk, tn), lambda i, j: (0, j)),   # W^T tile
            pl.BlockSpec((1, tn), lambda i, j: (0, j)),    # bias tile
        ]
        out_specs = pl.BlockSpec((tm, tn), lambda i, j: (i, j))
        scratch = []
        semantics = ("parallel", "parallel")
    else:
        grid = (M // tm, N // tn, n_k)
        in_specs = [
            pl.BlockSpec((tm, tk), lambda i, j, k: (i, k)),
            pl.BlockSpec((tk, tn), lambda i, j, k: (k, j)),
            pl.BlockSpec((1, tn), lambda i, j, k: (0, j)),
        ]
        out_specs = pl.BlockSpec((tm, tn), lambda i, j, k: (i, j))
        semantics = ("parallel", "parallel", "arbitrary")
        if out_dtype == jnp.float32:
            kernel = functools.partial(_kernel_multi_k_f32out, scale=params.scale)
            scratch = []
        else:
            kernel = functools.partial(_kernel_multi_k_acc, scale=params.scale)
            scratch = [pltpu.VMEM((tm, tn), jnp.float32)]

    out = pl.pallas_call(
        kernel,
        out_shape=jax.ShapeDtypeStruct((M, N), out_dtype),
        grid_spec=pltpu.PrefetchScalarGridSpec(
            num_scalar_prefetch=0,
            grid=grid,
            in_specs=in_specs,
            out_specs=out_specs,
            scratch_shapes=scratch,
        ),
        compiler_params=pltpu.CompilerParams(
            dimension_semantics=semantics,
            vmem_limit_bytes=vmem_limit,
        ),
        cost_estimate=cost,
    )(x_p, params.w_t, params.bias)

    return out[:batch, :params.out_dim]


if __name__ == "__main__":
    key = jax.random.PRNGKey(0)
    kx, kw, kx2, kw2 = jax.random.split(key, 4)

    # ---- small shape (single-K fast path) -----------------------------------
    batch, in_dim, out_dim = 2, 32, 16
    # Deterministic init mirroring the module: weight ~ N(0,1), bias = 0.
    weight_orig = jax.random.normal(kw, (out_dim, in_dim), dtype=jnp.float32)
    bias = jnp.zeros((out_dim,), dtype=jnp.float32)
    x = jax.random.normal(kx, (batch, in_dim), dtype=jnp.float32)

    params = prepare_equal_linear(weight_orig, bias)     # once, at "init"
    out = jax.block_until_ready(equal_linear(x, params))

    scale = math.sqrt(2.0 / in_dim)
    ref = x @ (weight_orig * scale).T + bias
    assert out.shape == (batch, out_dim)
    assert jnp.allclose(out, ref, atol=1e-5, rtol=1e-5), "small-shape mismatch"

    # ---- larger / odd shape (multi-K reduction path, pad + slice exercised) --
    batch2, in_dim2, out_dim2 = 40, 2560, 384
    w2 = jax.random.normal(kw2, (out_dim2, in_dim2), dtype=jnp.float32)
    bias2 = jnp.zeros((out_dim2,), dtype=jnp.float32)
    x2 = jax.random.normal(kx2, (batch2, in_dim2), dtype=jnp.float32)

    params2 = prepare_equal_linear(w2, bias2)
    out2 = jax.block_until_ready(equal_linear(x2, params2))
    ref2 = jnp.dot(x2, (w2 * math.sqrt(2.0 / in_dim2)).T,
                   precision=lax.Precision.HIGHEST) + bias2
    assert out2.shape == (batch2, out_dim2)
    assert jnp.allclose(out2, ref2, atol=2e-3, rtol=2e-3), "multi-K mismatch"

    print("KERNEL_OK")
</pallas_src>

<mosaic_0001>
module attributes {stable_mosaic.version = 11 : i64} {
  func.func @_kernel_single_k(%arg0: i32, %arg1: i32, %arg2: memref<8x128xf32, #tpu.memory_space<vmem>>, %arg3: memref<128x128xf32, #tpu.memory_space<vmem>>, %arg4: memref<1x128xf32, #tpu.memory_space<vmem>>, %arg5: memref<8x128xf32, #tpu.memory_space<vmem>>) attributes {dimension_semantics = [#tpu.dimension_semantics<parallel>, #tpu.dimension_semantics<parallel>], iteration_bounds = array<i64: 1, 1>, scalar_prefetch = 0 : i64, scratch_operands = 0 : i64, tpu.core_type = #tpu.core_type<tc>, window_params = [{transform_indices = @transform_0, window_bounds = array<i64: 8, 128>}, {transform_indices = @transform_1, window_bounds = array<i64: 128, 128>}, {transform_indices = @transform_2, window_bounds = array<i64: 1, 128>}, {transform_indices = @transform_3, window_bounds = array<i64: 8, 128>}]} {
    %c0 = arith.constant 0 : index
    %c0_0 = arith.constant 0 : index
    %0 = vector.load %arg2[%c0, %c0_0] : memref<8x128xf32, #tpu.memory_space<vmem>>, vector<8x128xf32>
    %c0_1 = arith.constant 0 : index
    %c0_2 = arith.constant 0 : index
    %1 = vector.load %arg3[%c0_1, %c0_2] : memref<128x128xf32, #tpu.memory_space<vmem>>, vector<128x128xf32>
    %cst = arith.constant dense<0.000000e+00> : vector<8x128xf32>
    %2 = tpu.matmul %0, %1, %cst {dimension_numbers = #tpu.dot_dimension_numbers<[1], [0], [0], [1], [0, 0, 1, 1], [], []>} : vector<8x128xf32>, vector<128x128xf32>, vector<8x128xf32> -> vector<8x128xf32>
    %cst_3 = arith.constant 2.500000e-01 : f32
    %3 = vector.broadcast %cst_3 : f32 to vector<8x128xf32>
    %4 = arith.mulf %2, %3 : vector<8x128xf32>
    %c0_4 = arith.constant 0 : index
    %c0_5 = arith.constant 0 : index
    %5 = vector.load %arg4[%c0_4, %c0_5] : memref<1x128xf32, #tpu.memory_space<vmem>>, vector<1x128xf32>
    %6 = vector.broadcast %5 : vector<1x128xf32> to vector<8x128xf32>
    %7 = arith.addf %4, %6 : vector<8x128xf32>
    %c0_6 = arith.constant 0 : index
    %c0_7 = arith.constant 0 : index
    %8 = vector.load %arg5[%c0_6, %c0_7] : memref<8x128xf32, #tpu.memory_space<vmem>>, vector<8x128xf32>
    tpu.vector_store %arg5[%c0_6, %c0_7], %7 {strides = array<i32>} : memref<8x128xf32, #tpu.memory_space<vmem>>, vector<8x128xf32>,
    return
  }
  func.func @transform_0(%arg0: i32, %arg1: i32) -> (i32, i32) {
    %c0_i32 = arith.constant 0 : i32
    %c0_i32_0 = arith.constant 0 : i32
    return %arg0, %c0_i32 : i32, i32
  }
  func.func @transform_1(%arg0: i32, %arg1: i32) -> (i32, i32) {
    %c0_i32 = arith.constant 0 : i32
    %c0_i32_0 = arith.constant 0 : i32
    return %c0_i32, %arg1 : i32, i32
  }
  func.func @transform_2(%arg0: i32, %arg1: i32) -> (i32, i32) {
    %c0_i32 = arith.constant 0 : i32
    %c0_i32_0 = arith.constant 0 : i32
    return %c0_i32, %arg1 : i32, i32
  }
  func.func @transform_3(%arg0: i32, %arg1: i32) -> (i32, i32) {
    %c0_i32 = arith.constant 0 : i32
    return %arg0, %arg1 : i32, i32
  }
}

</mosaic_0001>

<bundles_post_ra>
// kernel: tpu_custom_call.1
= control target key start
LH: loop header
LB: loop body
LE: loop exit
PB: predicated region body
PF: predicated region fallthrough
CT: control target
= control target key end

     0   :  { %8 = vsyncpa [#allocation3], 0  ;;  %s228_s0 = inlined_call_operand.hbm [shape: f32[8,128], index: 0, kind: input, shape index: {}]   ;;  %s229_s1 = inlined_call_operand.hbm [shape: f32[128,128], index: 1, kind: input, shape index: {}]   ;;  %s230_s2 = inlined_call_operand.vmem [shape: f32[1,128], index: 2, kind: input, shape index: {}]   ;;  %s231_s3 = inlined_call_operand.hbm [shape: f32[8,128], index: 3, kind: output, shape index: {}]  }
   0x1   :  { %9 = vsyncpa [#allocation6], 0 }
   0x2   :  { %10 = vsyncpa [#allocation4], 0  ;;  %s16_s14 = sshll.u32 %s228_s0, 4  ;;  %s191_s15 = smov [#allocation2]   ;;  %s17_s14 = int_to_ptr.hbm [resolvable:$true] %s16_s14 }
   0x3   :  { %s18_s16 = sshll.u32 %s191_s15, 4  ;;  %s26_s19 = sshll.u32 %s229_s1, 4  ;;  %s19_s16 = int_to_ptr.vmem [resolvable:$true] %s18_s16  ;;  %s27_s19 = int_to_ptr.hbm [resolvable:$true] %s26_s19 }
   0x4   :  { %21 = dma.hbm_to_vmem [thread:$0]  %s17_s14, 128, %s19_s16, [#allocation3]  }
   0x5   :  { %s192_s20 = smov [#allocation5]   ;;  %s193_s22 = smov 128  }
   0x6   :  { %s28_s21 = sshll.u32 %s192_s20, 4  ;;  %s194_s23 = smov 8   ;;  %s29_s21 = int_to_ptr.vmem [resolvable:$true] %s28_s21 }
   0x7   :  { %34 = dma.hbm_to_vmem [thread:$0]  %s27_s19, 2048, %s29_s21, [#allocation6], %s193_s22, %s193_s22, %s194_s23  }
   0x8   :  { %185 = dma.done.wait [#allocation3], 128  }
   0x9   :  { %186 = vsyncadd [#allocation3], 4294967168 }
   0xa   :  { %187 = dma.done.wait [#allocation6], 2048  }
   0xb   :  { %188 = vsyncadd [#allocation6], 4294965248  ;;  %v61_v0 = vld [vmem:[#allocation5 + $0x78] sm:$0xff]  ;;  %v60_v1 = vld [vmem:[#allocation5 + $0x70] sm:$0xff]  ;;  %s195_s24 = smov [#allocation7]   ;;  %s96_s28 = sshll.u32 %s231_s3, 4  ;;  %s97_s28 = int_to_ptr.hbm [resolvable:$true] %s96_s28 }
   0xc   :  { %62 = vmatpush.msra.mxu0 %v61_v0  ;;  %v59_v2 = vld [vmem:[#allocation5 + $0x68] sm:$0xff]  ;;  %v58_v3 = vld [vmem:[#allocation5 + $0x60] sm:$0xff]  ;;  %v57_v4 = vld [vmem:[#allocation5 + $0x58] sm:$0xff]  ;;  %s94_s25 = sshll.u32 %s195_s24, 4  ;;  %s95_s25 = int_to_ptr.vmem [resolvable:$true] %s94_s25 }
   0xd   :  { %v56_v5 = vld [vmem:[#allocation5 + $0x50] sm:$0xff]  ;;  %v55_v6 = vld [vmem:[#allocation5 + $0x48] sm:$0xff]  ;;  %v54_v7 = vld [vmem:[#allocation5 + $0x40] sm:$0xff] }
   0xe   :  { %63 = vmatpush.msra.mxu0 %v60_v1  ;;  %v53_v8 = vld [vmem:[#allocation5 + $0x38] sm:$0xff]  ;;  %v52_v9 = vld [vmem:[#allocation5 + $0x30] sm:$0xff]  ;;  %v51_v10 = vld [vmem:[#allocation5 + $0x28] sm:$0xff] }
   0xf   :  { %v50_v11 = vld [vmem:[#allocation5 + $0x20] sm:$0xff]  ;;  %v49_v12 = vld [vmem:[#allocation5 + $0x18] sm:$0xff]  ;;  %v48_v13 = vld [vmem:[#allocation5 + $0x10] sm:$0xff] }
  0x10   :  { %64 = vmatpush.msra.mxu0 %v59_v2  ;;  %v47_v14 = vld [vmem:[#allocation5 + $0x8] sm:$0xff]  ;;  %v46_v15 = vld [vmem:[#allocation5] sm:$0xff]  ;;  %v45_v16 = vld [vmem:[#allocation2] sm:$0xff] }
  0x11   :  { %v112_v17 = vld [vmem:[%s230_s2] ss:$0 sm:$0xff] }
  0x12   :  { %65 = vmatpush.msra.mxu0 %v58_v3 }
  0x14   :  { %66 = vmatpush.msra.mxu0 %v57_v4 }
  0x16   :  { %67 = vmatpush.msra.mxu0 %v56_v5 }
  0x18   :  { %68 = vmatpush.msra.mxu0 %v55_v6 }
  0x1a   :  { %69 = vmatpush.msra.mxu0 %v54_v7 }
  0x1c   :  { %70 = vmatpush.msra.mxu0 %v53_v8 }
  0x1e   :  { %71 = vmatpush.msra.mxu0 %v52_v9 }
  0x20   :  { %72 = vmatpush.msra.mxu0 %v51_v10 }
  0x22   :  { %73 = vmatpush.msra.mxu0 %v50_v11 }
  0x24   :  { %74 = vmatpush.msra.mxu0 %v49_v12 }
  0x26   :  { %75 = vmatpush.msra.mxu0 %v48_v13 }
  0x28   :  { %76 = vmatpush.msra.mxu0 %v47_v14 }
  0x2a   :  { %77 = vmatpush.msra.mxu0 %v46_v15 }
  0x2b   :  { %78 = vmatmul.f32.vlgmr.msra.gmra.mxu0 %v45_v16 }
  0xa8   :  { %v79_v18 = vpop.f32.mrf.mxu0 }
  0xa9   :  { %v82_v19 = vmul.f32 0.25, %v79_v18 }
  0xab   :  { %v87_v20 = vadd.f32 %v112_v17, %v82_v19 }
  0xad   :  { %88 = vst [vmem:[#allocation7] sm:$0xff] %v87_v20 }
  0xae   :  { %99 = dma.vmem_to_hbm [thread:$0]  %s95_s25, 128, %s97_s28, [#allocation4]  }
  0xaf   :  { %189 = dma.done.wait [#allocation4], 128  }
  0xb0   :  { %190 = vsyncadd [#allocation4], 4294967168 }
  0xb1   :  { %104 = vsyncpa [#allocation3], 1 }
  0xb2   :  { %105 = vsyncpa [#allocation6], 1 }
  0xb3   :  { %106 = vsyncpa [#allocation4], 1 }

</bundles_post_ra>
